<compile_context>
chip_gen: v7x
topology: tpu7x:2x2x1
jax: 0.10.0
libtpu: 0.0.40
codegen_flags: <defaults>
</compile_context>

<pallas_src>
import jax
import jax.numpy as jnp
from jax.experimental import pallas as pl
from jax.experimental.pallas import tpu as pltpu


def _sigmoid_kernel(x_ref, o_ref):
    x = x_ref[...]
    # Exact sigmoid: exp -> EUP, add + exact divide -> VALU.  For very negative
    # x, exp(-x) -> inf and 1/inf -> 0, which is the correct limit.
    o_ref[...] = 1.0 / (1.0 + jnp.exp(-x))


@jax.jit
def sigmoid_pallas(x_nchw: jax.Array) -> jax.Array:
    orig_shape = x_nchw.shape
    total = x_nchw.size

    LANES = 128
    pad = (-total) % LANES          # static at trace time
    flat = x_nchw.reshape(-1)
    if pad:
        flat = jnp.pad(flat, (0, pad))
    rows = flat.size // LANES       # 1536 f32 -> (12, 128): fully lane-dense
    x2d = flat.reshape(rows, LANES)

    out2d = pl.pallas_call(
        _sigmoid_kernel,
        out_shape=jax.ShapeDtypeStruct((rows, LANES), x2d.dtype),
        in_specs=[pl.BlockSpec(memory_space=pltpu.MemorySpace.VMEM)],
        out_specs=pl.BlockSpec(memory_space=pltpu.MemorySpace.VMEM),
    )(x2d)

    out_flat = out2d.reshape(-1)
    if pad:
        out_flat = out_flat[:total]
    return out_flat.reshape(orig_shape)


if __name__ == "__main__":
    key = jax.random.PRNGKey(0)
    # Matches the module's forward-pass input shape: torch.Size([1, 1536, 1, 1])
    x = jax.random.normal(key, (1, 1536, 1, 1), dtype=jnp.float32)

    y = sigmoid_pallas(x)
    jax.block_until_ready(y)

    # Sanity check against the pure-JAX reference (tight tolerance: exact math).
    y_ref = jax.nn.sigmoid(x)
    assert y.shape == x.shape and y.dtype == x.dtype
    assert jnp.allclose(y, y_ref, atol=1e-6, rtol=1e-6)

    print("KERNEL_OK")
</pallas_src>

<mosaic_0001>
module attributes {stable_mosaic.version = 11 : i64} {
  func.func @_sigmoid_kernel(%arg0: memref<12x128xf32, #tpu.memory_space<vmem>>, %arg1: memref<12x128xf32, #tpu.memory_space<vmem>>) attributes {dimension_semantics = [], scalar_prefetch = 0 : i64, scratch_operands = 0 : i64, tpu.core_type = #tpu.core_type<tc>} {
    %c0 = arith.constant 0 : index
    %c0_0 = arith.constant 0 : index
    %0 = vector.load %arg0[%c0, %c0_0] : memref<12x128xf32, #tpu.memory_space<vmem>>, vector<12x128xf32>
    %cst = arith.constant 0.000000e+00 : f32
    %1 = vector.broadcast %cst : f32 to vector<12x128xf32>
    %2 = arith.subf %1, %0 : vector<12x128xf32>
    %3 = math.exp %2 : vector<12x128xf32>
    %cst_1 = arith.constant 1.000000e+00 : f32
    %4 = vector.broadcast %cst_1 : f32 to vector<12x128xf32>
    %5 = arith.addf %4, %3 : vector<12x128xf32>
    %cst_2 = arith.constant 1.000000e+00 : f32
    %6 = vector.broadcast %cst_2 : f32 to vector<12x128xf32>
    %7 = arith.divf %6, %5 : vector<12x128xf32>
    %c0_3 = arith.constant 0 : index
    %c0_4 = arith.constant 0 : index
    %8 = vector.load %arg1[%c0_3, %c0_4] : memref<12x128xf32, #tpu.memory_space<vmem>>, vector<12x128xf32>
    tpu.vector_store %arg1[%c0_3, %c0_4], %7 {strides = array<i32>} : memref<12x128xf32, #tpu.memory_space<vmem>>, vector<12x128xf32>,
    return
  }
}

</mosaic_0001>

<bundles_post_ra>
// kernel: sigmoid_pallas.1
= control target key start
LH: loop header
LB: loop body
LE: loop exit
PB: predicated region body
PF: predicated region fallthrough
CT: control target
= control target key end

     0   :  { %s58_s0 = inlined_call_operand.vmem [shape: f32[12,128], index: 0, kind: input, shape index: {}]   ;;  %s59_s1 = inlined_call_operand.vmem [shape: f32[12,128], index: 1, kind: output, shape index: {}]  }
   0x1   :  { %v8_v0 = vld [vmem:[%s58_s0] sm:$0xff]  ;;  %v9_v1 = vld [vmem:[%s58_s0 + $0x8] sm:$0xf] }
   0x2   :  { %v10_v2 = vsub.f32 0.0, %v8_v0  ;;  %v11_v3 = vsub.f32 0.0, %v9_v1 }
   0x4   :  { %v12_v4 = vmul.f32 1.442695, %v10_v2  ;;  %v14_v5 = vmul.f32 1.442695, %v11_v3 }
   0x6   :  { %28 = vpow2.f32 %v12_v4 }
   0x7   :  { %30 = vpow2.f32 %v14_v5 }
  0x10   :  { %v29_v6 = vpop.eup %28 }
  0x11   :  { %v31_v7 = vpop.eup %30  ;;  %v16_v8 = vadd.f32 1.0, %v29_v6 }
  0x12   :  { %v17_v9 = vadd.f32 1.0, %v31_v7 }
  0x13   :  { %32 = vrcp.f32 %v16_v8 }
  0x14   :  { %34 = vrcp.f32 %v17_v9 }
  0x1d   :  { %v33_v10 = vpop.eup %32 }
  0x1e   :  { %v35_v11 = vpop.eup %34  ;;  %22 = vst [vmem:[%s59_s1] sm:$0xff] %v33_v10 }
  0x1f   :  { %23 = vst [vmem:[%s59_s1 + $0x8] sm:$0xf] %v35_v11 }

</bundles_post_ra>
